<compile_context>
chip_gen: v7x
topology: tpu7x:2x2x1
jax: 0.10.0
libtpu: 0.0.40
codegen_flags: <defaults>
</compile_context>

<pallas_src>
import math

import jax
import jax.numpy as jnp
from jax import lax
from jax.experimental import pallas as pl
from jax.experimental.pallas import tpu as pltpu

VOCAB_SIZE = 60
EMBED_SIZE = 128
HIDDEN_SIZE = 32
OUTPUT_SIZE = 18

# ---- packed-weight layout (all sections start on an 8-row boundary) --------
_V_PAD = 64                              # vocab rows padded 60 -> 64
_ROW_EMB = 0                             # emb           rows [  0,  64)
_ROW_WIH = _ROW_EMB + _V_PAD             # W_ih^T        rows [ 64, 192)
_ROW_WHH = _ROW_WIH + EMBED_SIZE         # W_hh^T        rows [192, 224)
_ROW_BG = _ROW_WHH + HIDDEN_SIZE         # b_ih + b_hh   row   224
_ROW_WOUT = _ROW_BG + 8                  # W_out^T       rows [232, 264)
_ROW_BOUT = _ROW_WOUT + HIDDEN_SIZE      # b_out         row   264
_PACK_ROWS = _ROW_BOUT + 8               # 272
_PACK_LANES = 4 * HIDDEN_SIZE            # 128 (== EMBED_SIZE)

assert _PACK_LANES == EMBED_SIZE == 4 * HIDDEN_SIZE


def _sigmoid(x):
    return 1.0 / (1.0 + jnp.exp(-x))


def _pack_padded_lstm_kernel(idx_ref, len_ref, w_ref, out_ref):
    bsz = len_ref.shape[0]
    seq_len = idx_ref.shape[0] // bsz
    hidden = HIDDEN_SIZE
    gate_w = 4 * hidden

    lengths = len_ref[...]                                          # (B, 1) int32

    # ---------------- pre-loop: hoist everything that is not recurrent ------
    # Fold Embedding into W_ih once: (V_pad, E) @ (E, 4H) -> (V_pad, 4H).
    emb = w_ref[_ROW_EMB:_ROW_EMB + _V_PAD, :].astype(jnp.bfloat16)
    w_ih = w_ref[_ROW_WIH:_ROW_WIH + EMBED_SIZE, :].astype(jnp.bfloat16)
    emb_wih = jnp.dot(emb, w_ih, preferred_element_type=jnp.float32)

    # One-hot for ALL T*B tokens at once, then the input part of every gate
    # as a single (T*B, V_pad) @ (V_pad, 4H) MXU matmul.
    idx_all = idx_ref[...]                                          # (T*B, 1)
    vocab_iota = lax.broadcasted_iota(jnp.int32, (seq_len * bsz, _V_PAD), 1)
    one_hot = (vocab_iota == idx_all).astype(jnp.bfloat16)          # (T*B, V_pad)
    b_g = w_ref[_ROW_BG:_ROW_BG + 1, :]                             # (1, 4H) f32
    gates_x = jnp.dot(one_hot, emb_wih.astype(jnp.bfloat16),
                      preferred_element_type=jnp.float32) + b_g     # (T*B, 4H) f32

    # Only W_hh and gates_x stay live across the unrolled recurrence.
    w_hh = w_ref[_ROW_WHH:_ROW_WHH + hidden, :].astype(jnp.bfloat16)  # (H, 4H)

    h = jnp.ones((bsz, hidden), jnp.float32)                        # torch.ones init
    c = jnp.ones((bsz, hidden), jnp.float32)

    # ---------------- recurrence (fully unrolled straight-line code) --------
    for t in range(seq_len):
        hh = jnp.dot(h.astype(jnp.bfloat16), w_hh,
                     preferred_element_type=jnp.float32)             # (B, 4H)
        gates = gates_x[t * bsz:(t + 1) * bsz, :] + hh               # (B, 4H)
        # Full-width activations on the 128-lane vreg, then slice quarters.
        sig = pl.reciprocal(1.0 + jnp.exp(-gates), approx=True)      # sigmoid, EUP
        tnh = jnp.tanh(gates)
        i_g = sig[:, 0 * hidden:1 * hidden]
        f_g = sig[:, 1 * hidden:2 * hidden]
        g_g = tnh[:, 2 * hidden:3 * hidden]
        o_g = sig[:, 3 * hidden:4 * hidden]
        c_new = f_g * c + i_g * g_g
        h_new = o_g * jnp.tanh(c_new)
        # pack_padded semantics: freeze (h, c) of row b once t >= lengths[b].
        valid = lengths > t                                          # (B, 1) bool
        h = jnp.where(valid, h_new, h)
        c = jnp.where(valid, c_new, c)

    # ---------------- epilogue: hidden2out + log_softmax --------------------
    # TODO(synk): nn.Dropout(p=0.2) is treated as eval-mode identity (no RNG mask).
    w_out = w_ref[_ROW_WOUT:_ROW_WOUT + hidden, :].astype(jnp.bfloat16)  # zero-padded cols
    b_out = w_ref[_ROW_BOUT:_ROW_BOUT + 1, :]                            # (1, 128) f32
    logits_full = jnp.dot(h.astype(jnp.bfloat16), w_out,
                          preferred_element_type=jnp.float32) + b_out    # (B, 128)
    logits = logits_full[:, :OUTPUT_SIZE]                                # (B, O)
    m = jnp.max(logits, axis=1, keepdims=True)
    shifted = logits - m
    lse = jnp.log(jnp.sum(jnp.exp(shifted), axis=1, keepdims=True))
    out_ref[...] = (shifted - lse).astype(out_ref.dtype)


def _pack_weights(params):
    """Pack all weights/biases into one lane-dense (272, 128) f32 array."""
    def pad(x, nrows):
        x = x.astype(jnp.float32)
        return jnp.pad(x, ((0, nrows - x.shape[0]), (0, _PACK_LANES - x.shape[1])))
    return jnp.concatenate([
        pad(params["embedding"], _V_PAD),          # (V, E)   -> rows [0, 64)
        pad(params["w_ih_t"], EMBED_SIZE),         # (E, 4H)  -> rows [64, 192)
        pad(params["w_hh_t"], HIDDEN_SIZE),        # (H, 4H)  -> rows [192, 224)
        pad(params["b_gates"], 8),                 # (1, 4H)  -> row  224
        pad(params["w_out_t"], HIDDEN_SIZE),       # (H, O)   -> rows [232, 264)
        pad(params["b_out"], 8),                   # (1, O)   -> row  264
    ], axis=0)                                     # (272, 128)


def pack_padded_lstm_forward(batch_idx, lengths, params):
    """batch_idx: (T, B) int32 token ids; lengths: (B,) int32 (sorted descending)."""
    seq_len, bsz = batch_idx.shape
    idx2 = batch_idx.astype(jnp.int32).reshape(seq_len * bsz, 1)   # row t*B+b
    len2 = lengths.astype(jnp.int32).reshape(bsz, 1)
    w_packed = _pack_weights(params)

    def full_spec(arr):
        nd = arr.ndim
        # Block == full array (always legal), single grid step.
        return pl.BlockSpec(arr.shape, lambda i, nd=nd: (0,) * nd)

    grid_spec = pltpu.PrefetchScalarGridSpec(
        num_scalar_prefetch=0,
        grid=(1,),
        in_specs=[full_spec(idx2), full_spec(len2), full_spec(w_packed)],
        out_specs=pl.BlockSpec((bsz, OUTPUT_SIZE), lambda i: (0, 0)),
    )

    return pl.pallas_call(
        _pack_padded_lstm_kernel,
        out_shape=jax.ShapeDtypeStruct((bsz, OUTPUT_SIZE), jnp.float32),
        grid_spec=grid_spec,
        compiler_params=pltpu.CompilerParams(
            dimension_semantics=("arbitrary",),
        ),
    )(idx2, len2, w_packed)


def _reference_forward(batch_idx, lengths, params):
    """Pure-JAX f32 reference mirroring the PyTorch forward (dropout = identity)."""
    emb = params["embedding"]
    w_ih_t, w_hh_t, b_g = params["w_ih_t"], params["w_hh_t"], params["b_gates"]
    w_out_t, b_out = params["w_out_t"], params["b_out"]
    seq_len, bsz = batch_idx.shape
    hidden = w_hh_t.shape[0]

    embeds = emb[batch_idx]                                    # (T, B, E)
    h = jnp.ones((bsz, hidden), jnp.float32)
    c = jnp.ones((bsz, hidden), jnp.float32)
    for t in range(seq_len):
        gates = embeds[t] @ w_ih_t + h @ w_hh_t + b_g
        i_g = _sigmoid(gates[:, :hidden])
        f_g = _sigmoid(gates[:, hidden:2 * hidden])
        g_g = jnp.tanh(gates[:, 2 * hidden:3 * hidden])
        o_g = _sigmoid(gates[:, 3 * hidden:])
        c_new = f_g * c + i_g * g_g
        h_new = o_g * jnp.tanh(c_new)
        valid = (t < lengths)[:, None]
        h = jnp.where(valid, h_new, h)
        c = jnp.where(valid, c_new, c)
    logits = h @ w_out_t + b_out
    return jax.nn.log_softmax(logits, axis=1)


def init_params(key, vocab=VOCAB_SIZE, embed=EMBED_SIZE,
                hidden=HIDDEN_SIZE, out=OUTPUT_SIZE):
    ks = jax.random.split(key, 7)
    k = 1.0 / math.sqrt(hidden)
    return {
        # nn.Embedding.weight ~ N(0, 1)
        "embedding": jax.random.normal(ks[0], (vocab, embed), jnp.float32),
        # LSTM weights stored pre-transposed, gate order [i, f, g, o] on the 4H axis.
        "w_ih_t": jax.random.uniform(ks[1], (embed, 4 * hidden), jnp.float32, -k, k),
        "w_hh_t": jax.random.uniform(ks[2], (hidden, 4 * hidden), jnp.float32, -k, k),
        "b_gates": (jax.random.uniform(ks[3], (1, 4 * hidden), jnp.float32, -k, k)
                    + jax.random.uniform(ks[4], (1, 4 * hidden), jnp.float32, -k, k)),
        # hidden2out Linear: weight.T and bias.
        "w_out_t": jax.random.uniform(ks[5], (hidden, out), jnp.float32, -k, k),
        "b_out": jax.random.uniform(ks[6], (1, out), jnp.float32, -k, k),
    }


if __name__ == "__main__":
    key = jax.random.PRNGKey(0)
    k_param, k_data = jax.random.split(key)
    params = init_params(k_param)

    seq_len, bsz = 8, 2
    batch_idx = jax.random.randint(k_data, (seq_len, bsz), 0, VOCAB_SIZE,
                                   dtype=jnp.int32)
    # pack_padded_sequence (enforce_sorted=True) expects descending lengths.
    lengths = jnp.array([8, 5], dtype=jnp.int32)

    fwd = jax.jit(pack_padded_lstm_forward)
    out = jax.block_until_ready(fwd(batch_idx, lengths, params))
    ref = _reference_forward(batch_idx, lengths, params)

    assert out.shape == (bsz, OUTPUT_SIZE)
    assert out.dtype == jnp.float32
    # log-softmax rows must normalize to 1.
    assert bool(jnp.all(jnp.abs(jnp.sum(jnp.exp(out), axis=1) - 1.0) < 1e-3))
    # Match the pure-JAX f32 reference (tolerance covers bf16 MXU operands and
    # the approx-reciprocal sigmoid accumulated over the 8-step recurrence).
    assert bool(jnp.allclose(out, ref, atol=3e-2, rtol=3e-2))

    print("KERNEL_OK")
</pallas_src>

<mosaic_0001>
module attributes {stable_mosaic.version = 11 : i64} {
  func.func @_pack_padded_lstm_kernel(%arg0: i32, %arg1: memref<16x1xi32, #tpu.memory_space<vmem>>, %arg2: memref<2x1xi32, #tpu.memory_space<vmem>>, %arg3: memref<272x128xf32, #tpu.memory_space<vmem>>, %arg4: memref<2x18xf32, #tpu.memory_space<vmem>>) attributes {dimension_semantics = [#tpu.dimension_semantics<arbitrary>], iteration_bounds = array<i64: 1>, scalar_prefetch = 0 : i64, scratch_operands = 0 : i64, tpu.core_type = #tpu.core_type<tc>, window_params = [{pipeline_mode = #tpu.pipeline_mode<synchronous>, transform_indices = @transform_0, window_bounds = array<i64: 16, 1>}, {pipeline_mode = #tpu.pipeline_mode<synchronous>, transform_indices = @transform_1, window_bounds = array<i64: 2, 1>}, {pipeline_mode = #tpu.pipeline_mode<synchronous>, transform_indices = @transform_2, window_bounds = array<i64: 272, 128>}, {pipeline_mode = #tpu.pipeline_mode<synchronous>, transform_indices = @transform_3, window_bounds = array<i64: 2, 18>}]} {
    %c0 = arith.constant 0 : index
    %c0_0 = arith.constant 0 : index
    %0 = vector.load %arg2[%c0, %c0_0] : memref<2x1xi32, #tpu.memory_space<vmem>>, vector<2x1xi32>
    %c0_1 = arith.constant 0 : index
    %c0_2 = arith.constant 0 : index
    %1 = vector.load %arg3[%c0_1, %c0_2] : memref<272x128xf32, #tpu.memory_space<vmem>>, vector<64x128xf32>
    %2 = arith.truncf %1 : vector<64x128xf32> to vector<64x128xbf16>
    %c64 = arith.constant 64 : index
    %c0_3 = arith.constant 0 : index
    %3 = vector.load %arg3[%c64, %c0_3] : memref<272x128xf32, #tpu.memory_space<vmem>>, vector<128x128xf32>
    %4 = arith.truncf %3 : vector<128x128xf32> to vector<128x128xbf16>
    %cst = arith.constant dense<0.000000e+00> : vector<64x128xf32>
    %5 = tpu.matmul %2, %4, %cst {dimension_numbers = #tpu.dot_dimension_numbers<[1], [0], [0], [1], [0, 0, 1, 1], [], []>} : vector<64x128xbf16>, vector<128x128xbf16>, vector<64x128xf32> -> vector<64x128xf32>
    %c0_4 = arith.constant 0 : index
    %c0_5 = arith.constant 0 : index
    %6 = vector.load %arg1[%c0_4, %c0_5] : memref<16x1xi32, #tpu.memory_space<vmem>>, vector<16x1xi32>
    %7 = tpu.iota {dimensions = array<i32: 1>} : vector<16x64xi32>
    %8 = vector.broadcast %6 : vector<16x1xi32> to vector<16x64xi32>
    %9 = arith.cmpi eq, %7, %8 : vector<16x64xi32>
    %10 = arith.extui %9 : vector<16x64xi1> to vector<16x64xi32>
    %11 = arith.sitofp %10 : vector<16x64xi32> to vector<16x64xf32>
    %12 = arith.truncf %11 : vector<16x64xf32> to vector<16x64xbf16>
    %c224 = arith.constant 224 : index
    %c0_6 = arith.constant 0 : index
    %13 = vector.load %arg3[%c224, %c0_6] : memref<272x128xf32, #tpu.memory_space<vmem>>, vector<1x128xf32>
    %14 = arith.truncf %5 : vector<64x128xf32> to vector<64x128xbf16>
    %cst_7 = arith.constant dense<0.000000e+00> : vector<16x128xf32>
    %15 = tpu.matmul %12, %14, %cst_7 {dimension_numbers = #tpu.dot_dimension_numbers<[1], [0], [0], [1], [0, 0, 1, 1], [], []>} : vector<16x64xbf16>, vector<64x128xbf16>, vector<16x128xf32> -> vector<16x128xf32>
    %16 = vector.broadcast %13 : vector<1x128xf32> to vector<16x128xf32>
    %17 = arith.addf %15, %16 : vector<16x128xf32>
    %c192 = arith.constant 192 : index
    %c0_8 = arith.constant 0 : index
    %18 = vector.load %arg3[%c192, %c0_8] : memref<272x128xf32, #tpu.memory_space<vmem>>, vector<32x128xf32>
    %19 = arith.truncf %18 : vector<32x128xf32> to vector<32x128xbf16>
    %cst_9 = arith.constant 1.000000e+00 : f32
    %20 = vector.broadcast %cst_9 : f32 to vector<2x32xf32>
    %cst_10 = arith.constant 1.000000e+00 : f32
    %21 = vector.broadcast %cst_10 : f32 to vector<2x32xf32>
    %22 = arith.truncf %20 : vector<2x32xf32> to vector<2x32xbf16>
    %cst_11 = arith.constant dense<0.000000e+00> : vector<2x128xf32>
    %23 = tpu.matmul %22, %19, %cst_11 {dimension_numbers = #tpu.dot_dimension_numbers<[1], [0], [0], [1], [0, 0, 1, 1], [], []>} : vector<2x32xbf16>, vector<32x128xbf16>, vector<2x128xf32> -> vector<2x128xf32>
    %24 = vector.extract_strided_slice %17 {offsets = [0, 0], sizes = [2, 128], strides = [1, 1]} : vector<16x128xf32> to vector<2x128xf32>
    %25 = arith.addf %24, %23 : vector<2x128xf32>
    %cst_12 = arith.constant 0.000000e+00 : f32
    %26 = vector.broadcast %cst_12 : f32 to vector<2x128xf32>
    %27 = arith.subf %26, %25 : vector<2x128xf32>
    %28 = math.exp %27 : vector<2x128xf32>
    %cst_13 = arith.constant 1.000000e+00 : f32
    %29 = vector.broadcast %cst_13 : f32 to vector<2x128xf32>
    %30 = arith.addf %29, %28 : vector<2x128xf32>
    %31 = tpu.reciprocal %30 {approx = true} : vector<2x128xf32> -> vector<2x128xf32>
    %32 = math.tanh %25 : vector<2x128xf32>
    %33 = vector.extract_strided_slice %31 {offsets = [0, 0], sizes = [2, 32], strides = [1, 1]} : vector<2x128xf32> to vector<2x32xf32>
    %34 = vector.extract_strided_slice %31 {offsets = [0, 32], sizes = [2, 32], strides = [1, 1]} : vector<2x128xf32> to vector<2x32xf32>
    %35 = vector.extract_strided_slice %32 {offsets = [0, 64], sizes = [2, 32], strides = [1, 1]} : vector<2x128xf32> to vector<2x32xf32>
    %36 = vector.extract_strided_slice %31 {offsets = [0, 96], sizes = [2, 32], strides = [1, 1]} : vector<2x128xf32> to vector<2x32xf32>
    %37 = arith.mulf %34, %21 : vector<2x32xf32>
    %38 = arith.mulf %33, %35 : vector<2x32xf32>
    %39 = arith.addf %37, %38 : vector<2x32xf32>
    %40 = math.tanh %39 : vector<2x32xf32>
    %41 = arith.mulf %36, %40 : vector<2x32xf32>
    %c0_i32 = arith.constant 0 : i32
    %42 = vector.broadcast %c0_i32 : i32 to vector<2x1xi32>
    %43 = arith.cmpi sgt, %0, %42 : vector<2x1xi32>
    %44 = vector.shape_cast %43 : vector<2x1xi1> to vector<2x1xi1>
    %45 = vector.broadcast %44 : vector<2x1xi1> to vector<2x32xi1>
    %46 = arith.select %45, %41, %20 : vector<2x32xi1>, vector<2x32xf32>
    %47 = vector.shape_cast %43 : vector<2x1xi1> to vector<2x1xi1>
    %48 = vector.broadcast %47 : vector<2x1xi1> to vector<2x32xi1>
    %49 = arith.select %48, %39, %21 : vector<2x32xi1>, vector<2x32xf32>
    %50 = arith.truncf %46 : vector<2x32xf32> to vector<2x32xbf16>
    %cst_14 = arith.constant dense<0.000000e+00> : vector<2x128xf32>
    %51 = tpu.matmul %50, %19, %cst_14 {dimension_numbers = #tpu.dot_dimension_numbers<[1], [0], [0], [1], [0, 0, 1, 1], [], []>} : vector<2x32xbf16>, vector<32x128xbf16>, vector<2x128xf32> -> vector<2x128xf32>
    %52 = vector.extract_strided_slice %17 {offsets = [2, 0], sizes = [2, 128], strides = [1, 1]} : vector<16x128xf32> to vector<2x128xf32>
    %53 = arith.addf %52, %51 : vector<2x128xf32>
    %cst_15 = arith.constant 0.000000e+00 : f32
    %54 = vector.broadcast %cst_15 : f32 to vector<2x128xf32>
    %55 = arith.subf %54, %53 : vector<2x128xf32>
    %56 = math.exp %55 : vector<2x128xf32>
    %cst_16 = arith.constant 1.000000e+00 : f32
    %57 = vector.broadcast %cst_16 : f32 to vector<2x128xf32>
    %58 = arith.addf %57, %56 : vector<2x128xf32>
    %59 = tpu.reciprocal %58 {approx = true} : vector<2x128xf32> -> vector<2x128xf32>
    %60 = math.tanh %53 : vector<2x128xf32>
    %61 = vector.extract_strided_slice %59 {offsets = [0, 0], sizes = [2, 32], strides = [1, 1]} : vector<2x128xf32> to vector<2x32xf32>
    %62 = vector.extract_strided_slice %59 {offsets = [0, 32], sizes = [2, 32], strides = [1, 1]} : vector<2x128xf32> to vector<2x32xf32>
    %63 = vector.extract_strided_slice %60 {offsets = [0, 64], sizes = [2, 32], strides = [1, 1]} : vector<2x128xf32> to vector<2x32xf32>
    %64 = vector.extract_strided_slice %59 {offsets = [0, 96], sizes = [2, 32], strides = [1, 1]} : vector<2x128xf32> to vector<2x32xf32>
    %65 = arith.mulf %62, %49 : vector<2x32xf32>
    %66 = arith.mulf %61, %63 : vector<2x32xf32>
    %67 = arith.addf %65, %66 : vector<2x32xf32>
    %68 = math.tanh %67 : vector<2x32xf32>
    %69 = arith.mulf %64, %68 : vector<2x32xf32>
    %c1_i32 = arith.constant 1 : i32
    %70 = vector.broadcast %c1_i32 : i32 to vector<2x1xi32>
    %71 = arith.cmpi sgt, %0, %70 : vector<2x1xi32>
    %72 = vector.shape_cast %71 : vector<2x1xi1> to vector<2x1xi1>
    %73 = vector.broadcast %72 : vector<2x1xi1> to vector<2x32xi1>
    %74 = arith.select %73, %69, %46 : vector<2x32xi1>, vector<2x32xf32>
    %75 = vector.shape_cast %71 : vector<2x1xi1> to vector<2x1xi1>
    %76 = vector.broadcast %75 : vector<2x1xi1> to vector<2x32xi1>
    %77 = arith.select %76, %67, %49 : vector<2x32xi1>, vector<2x32xf32>
    %78 = arith.truncf %74 : vector<2x32xf32> to vector<2x32xbf16>
    %cst_17 = arith.constant dense<0.000000e+00> : vector<2x128xf32>
    %79 = tpu.matmul %78, %19, %cst_17 {dimension_numbers = #tpu.dot_dimension_numbers<[1], [0], [0], [1], [0, 0, 1, 1], [], []>} : vector<2x32xbf16>, vector<32x128xbf16>, vector<2x128xf32> -> vector<2x128xf32>
    %80 = vector.extract_strided_slice %17 {offsets = [4, 0], sizes = [2, 128], strides = [1, 1]} : vector<16x128xf32> to vector<2x128xf32>
    %81 = arith.addf %80, %79 : vector<2x128xf32>
    %cst_18 = arith.constant 0.000000e+00 : f32
    %82 = vector.broadcast %cst_18 : f32 to vector<2x128xf32>
    %83 = arith.subf %82, %81 : vector<2x128xf32>
    %84 = math.exp %83 : vector<2x128xf32>
    %cst_19 = arith.constant 1.000000e+00 : f32
    %85 = vector.broadcast %cst_19 : f32 to vector<2x128xf32>
    %86 = arith.addf %85, %84 : vector<2x128xf32>
    %87 = tpu.reciprocal %86 {approx = true} : vector<2x128xf32> -> vector<2x128xf32>
    %88 = math.tanh %81 : vector<2x128xf32>
    %89 = vector.extract_strided_slice %87 {offsets = [0, 0], sizes = [2, 32], strides = [1, 1]} : vector<2x128xf32> to vector<2x32xf32>
    %90 = vector.extract_strided_slice %87 {offsets = [0, 32], sizes = [2, 32], strides = [1, 1]} : vector<2x128xf32> to vector<2x32xf32>
    %91 = vector.extract_strided_slice %88 {offsets = [0, 64], sizes = [2, 32], strides = [1, 1]} : vector<2x128xf32> to vector<2x32xf32>
    %92 = vector.extract_strided_slice %87 {offsets = [0, 96], sizes = [2, 32], strides = [1, 1]} : vector<2x128xf32> to vector<2x32xf32>
    %93 = arith.mulf %90, %77 : vector<2x32xf32>
    %94 = arith.mulf %89, %91 : vector<2x32xf32>
    %95 = arith.addf %93, %94 : vector<2x32xf32>
    %96 = math.tanh %95 : vector<2x32xf32>
    %97 = arith.mulf %92, %96 : vector<2x32xf32>
    %c2_i32 = arith.constant 2 : i32
    %98 = vector.broadcast %c2_i32 : i32 to vector<2x1xi32>
    %99 = arith.cmpi sgt, %0, %98 : vector<2x1xi32>
    %100 = vector.shape_cast %99 : vector<2x1xi1> to vector<2x1xi1>
    %101 = vector.broadcast %100 : vector<2x1xi1> to vector<2x32xi1>
    %102 = arith.select %101, %97, %74 : vector<2x32xi1>, vector<2x32xf32>
    %103 = vector.shape_cast %99 : vector<2x1xi1> to vector<2x1xi1>
    %104 = vector.broadcast %103 : vector<2x1xi1> to vector<2x32xi1>
    %105 = arith.select %104, %95, %77 : vector<2x32xi1>, vector<2x32xf32>
    %106 = arith.truncf %102 : vector<2x32xf32> to vector<2x32xbf16>
    %cst_20 = arith.constant dense<0.000000e+00> : vector<2x128xf32>
    %107 = tpu.matmul %106, %19, %cst_20 {dimension_numbers = #tpu.dot_dimension_numbers<[1], [0], [0], [1], [0, 0, 1, 1], [], []>} : vector<2x32xbf16>, vector<32x128xbf16>, vector<2x128xf32> -> vector<2x128xf32>
    %108 = vector.extract_strided_slice %17 {offsets = [6, 0], sizes = [2, 128], strides = [1, 1]} : vector<16x128xf32> to vector<2x128xf32>
    %109 = arith.addf %108, %107 : vector<2x128xf32>
    %cst_21 = arith.constant 0.000000e+00 : f32
    %110 = vector.broadcast %cst_21 : f32 to vector<2x128xf32>
    %111 = arith.subf %110, %109 : vector<2x128xf32>
    %112 = math.exp %111 : vector<2x128xf32>
    %cst_22 = arith.constant 1.000000e+00 : f32
    %113 = vector.broadcast %cst_22 : f32 to vector<2x128xf32>
    %114 = arith.addf %113, %112 : vector<2x128xf32>
    %115 = tpu.reciprocal %114 {approx = true} : vector<2x128xf32> -> vector<2x128xf32>
    %116 = math.tanh %109 : vector<2x128xf32>
    %117 = vector.extract_strided_slice %115 {offsets = [0, 0], sizes = [2, 32], strides = [1, 1]} : vector<2x128xf32> to vector<2x32xf32>
    %118 = vector.extract_strided_slice %115 {offsets = [0, 32], sizes = [2, 32], strides = [1, 1]} : vector<2x128xf32> to vector<2x32xf32>
    %119 = vector.extract_strided_slice %116 {offsets = [0, 64], sizes = [2, 32], strides = [1, 1]} : vector<2x128xf32> to vector<2x32xf32>
    %120 = vector.extract_strided_slice %115 {offsets = [0, 96], sizes = [2, 32], strides = [1, 1]} : vector<2x128xf32> to vector<2x32xf32>
    %121 = arith.mulf %118, %105 : vector<2x32xf32>
    %122 = arith.mulf %117, %119 : vector<2x32xf32>
    %123 = arith.addf %121, %122 : vector<2x32xf32>
    %124 = math.tanh %123 : vector<2x32xf32>
    %125 = arith.mulf %120, %124 : vector<2x32xf32>
    %c3_i32 = arith.constant 3 : i32
    %126 = vector.broadcast %c3_i32 : i32 to vector<2x1xi32>
    %127 = arith.cmpi sgt, %0, %126 : vector<2x1xi32>
    %128 = vector.shape_cast %127 : vector<2x1xi1> to vector<2x1xi1>
    %129 = vector.broadcast %128 : vector<2x1xi1> to vector<2x32xi1>
    %130 = arith.select %129, %125, %102 : vector<2x32xi1>, vector<2x32xf32>
    %131 = vector.shape_cast %127 : vector<2x1xi1> to vector<2x1xi1>
    %132 = vector.broadcast %131 : vector<2x1xi1> to vector<2x32xi1>
    %133 = arith.select %132, %123, %105 : vector<2x32xi1>, vector<2x32xf32>
    %134 = arith.truncf %130 : vector<2x32xf32> to vector<2x32xbf16>
    %cst_23 = arith.constant dense<0.000000e+00> : vector<2x128xf32>
    %135 = tpu.matmul %134, %19, %cst_23 {dimension_numbers = #tpu.dot_dimension_numbers<[1], [0], [0], [1], [0, 0, 1, 1], [], []>} : vector<2x32xbf16>, vector<32x128xbf16>, vector<2x128xf32> -> vector<2x128xf32>
    %136 = vector.extract_strided_slice %17 {offsets = [8, 0], sizes = [2, 128], strides = [1, 1]} : vector<16x128xf32> to vector<2x128xf32>
    %137 = arith.addf %136, %135 : vector<2x128xf32>
    %cst_24 = arith.constant 0.000000e+00 : f32
    %138 = vector.broadcast %cst_24 : f32 to vector<2x128xf32>
    %139 = arith.subf %138, %137 : vector<2x128xf32>
    %140 = math.exp %139 : vector<2x128xf32>
    %cst_25 = arith.constant 1.000000e+00 : f32
    %141 = vector.broadcast %cst_25 : f32 to vector<2x128xf32>
    %142 = arith.addf %141, %140 : vector<2x128xf32>
    %143 = tpu.reciprocal %142 {approx = true} : vector<2x128xf32> -> vector<2x128xf32>
    %144 = math.tanh %137 : vector<2x128xf32>
    %145 = vector.extract_strided_slice %143 {offsets = [0, 0], sizes = [2, 32], strides = [1, 1]} : vector<2x128xf32> to vector<2x32xf32>
    %146 = vector.extract_strided_slice %143 {offsets = [0, 32], sizes = [2, 32], strides = [1, 1]} : vector<2x128xf32> to vector<2x32xf32>
    %147 = vector.extract_strided_slice %144 {offsets = [0, 64], sizes = [2, 32], strides = [1, 1]} : vector<2x128xf32> to vector<2x32xf32>
    %148 = vector.extract_strided_slice %143 {offsets = [0, 96], sizes = [2, 32], strides = [1, 1]} : vector<2x128xf32> to vector<2x32xf32>
    %149 = arith.mulf %146, %133 : vector<2x32xf32>
    %150 = arith.mulf %145, %147 : vector<2x32xf32>
    %151 = arith.addf %149, %150 : vector<2x32xf32>
    %152 = math.tanh %151 : vector<2x32xf32>
    %153 = arith.mulf %148, %152 : vector<2x32xf32>
    %c4_i32 = arith.constant 4 : i32
    %154 = vector.broadcast %c4_i32 : i32 to vector<2x1xi32>
    %155 = arith.cmpi sgt, %0, %154 : vector<2x1xi32>
    %156 = vector.shape_cast %155 : vector<2x1xi1> to vector<2x1xi1>
    %157 = vector.broadcast %156 : vector<2x1xi1> to vector<2x32xi1>
    %158 = arith.select %157, %153, %130 : vector<2x32xi1>, vector<2x32xf32>
    %159 = vector.shape_cast %155 : vector<2x1xi1> to vector<2x1xi1>
    %160 = vector.broadcast %159 : vector<2x1xi1> to vector<2x32xi1>
    %161 = arith.select %160, %151, %133 : vector<2x32xi1>, vector<2x32xf32>
    %162 = arith.truncf %158 : vector<2x32xf32> to vector<2x32xbf16>
    %cst_26 = arith.constant dense<0.000000e+00> : vector<2x128xf32>
    %163 = tpu.matmul %162, %19, %cst_26 {dimension_numbers = #tpu.dot_dimension_numbers<[1], [0], [0], [1], [0, 0, 1, 1], [], []>} : vector<2x32xbf16>, vector<32x128xbf16>, vector<2x128xf32> -> vector<2x128xf32>
    %164 = vector.extract_strided_slice %17 {offsets = [10, 0], sizes = [2, 128], strides = [1, 1]} : vector<16x128xf32> to vector<2x128xf32>
    %165 = arith.addf %164, %163 : vector<2x128xf32>
    %cst_27 = arith.constant 0.000000e+00 : f32
    %166 = vector.broadcast %cst_27 : f32 to vector<2x128xf32>
    %167 = arith.subf %166, %165 : vector<2x128xf32>
    %168 = math.exp %167 : vector<2x128xf32>
    %cst_28 = arith.constant 1.000000e+00 : f32
    %169 = vector.broadcast %cst_28 : f32 to vector<2x128xf32>
    %170 = arith.addf %169, %168 : vector<2x128xf32>
    %171 = tpu.reciprocal %170 {approx = true} : vector<2x128xf32> -> vector<2x128xf32>
    %172 = math.tanh %165 : vector<2x128xf32>
    %173 = vector.extract_strided_slice %171 {offsets = [0, 0], sizes = [2, 32], strides = [1, 1]} : vector<2x128xf32> to vector<2x32xf32>
    %174 = vector.extract_strided_slice %171 {offsets = [0, 32], sizes = [2, 32], strides = [1, 1]} : vector<2x128xf32> to vector<2x32xf32>
    %175 = vector.extract_strided_slice %172 {offsets = [0, 64], sizes = [2, 32], strides = [1, 1]} : vector<2x128xf32> to vector<2x32xf32>
    %176 = vector.extract_strided_slice %171 {offsets = [0, 96], sizes = [2, 32], strides = [1, 1]} : vector<2x128xf32> to vector<2x32xf32>
    %177 = arith.mulf %174, %161 : vector<2x32xf32>
    %178 = arith.mulf %173, %175 : vector<2x32xf32>
    %179 = arith.addf %177, %178 : vector<2x32xf32>
    %180 = math.tanh %179 : vector<2x32xf32>
    %181 = arith.mulf %176, %180 : vector<2x32xf32>
    %c5_i32 = arith.constant 5 : i32
    %182 = vector.broadcast %c5_i32 : i32 to vector<2x1xi32>
    %183 = arith.cmpi sgt, %0, %182 : vector<2x1xi32>
    %184 = vector.shape_cast %183 : vector<2x1xi1> to vector<2x1xi1>
    %185 = vector.broadcast %184 : vector<2x1xi1> to vector<2x32xi1>
    %186 = arith.select %185, %181, %158 : vector<2x32xi1>, vector<2x32xf32>
    %187 = vector.shape_cast %183 : vector<2x1xi1> to vector<2x1xi1>
    %188 = vector.broadcast %187 : vector<2x1xi1> to vector<2x32xi1>
    %189 = arith.select %188, %179, %161 : vector<2x32xi1>, vector<2x32xf32>
    %190 = arith.truncf %186 : vector<2x32xf32> to vector<2x32xbf16>
    %cst_29 = arith.constant dense<0.000000e+00> : vector<2x128xf32>
    %191 = tpu.matmul %190, %19, %cst_29 {dimension_numbers = #tpu.dot_dimension_numbers<[1], [0], [0], [1], [0, 0, 1, 1], [], []>} : vector<2x32xbf16>, vector<32x128xbf16>, vector<2x128xf32> -> vector<2x128xf32>
    %192 = vector.extract_strided_slice %17 {offsets = [12, 0], sizes = [2, 128], strides = [1, 1]} : vector<16x128xf32> to vector<2x128xf32>
    %193 = arith.addf %192, %191 : vector<2x128xf32>
    %cst_30 = arith.constant 0.000000e+00 : f32
    %194 = vector.broadcast %cst_30 : f32 to vector<2x128xf32>
    %195 = arith.subf %194, %193 : vector<2x128xf32>
    %196 = math.exp %195 : vector<2x128xf32>
    %cst_31 = arith.constant 1.000000e+00 : f32
    %197 = vector.broadcast %cst_31 : f32 to vector<2x128xf32>
    %198 = arith.addf %197, %196 : vector<2x128xf32>
    %199 = tpu.reciprocal %198 {approx = true} : vector<2x128xf32> -> vector<2x128xf32>
    %200 = math.tanh %193 : vector<2x128xf32>
    %201 = vector.extract_strided_slice %199 {offsets = [0, 0], sizes = [2, 32], strides = [1, 1]} : vector<2x128xf32> to vector<2x32xf32>
    %202 = vector.extract_strided_slice %199 {offsets = [0, 32], sizes = [2, 32], strides = [1, 1]} : vector<2x128xf32> to vector<2x32xf32>
    %203 = vector.extract_strided_slice %200 {offsets = [0, 64], sizes = [2, 32], strides = [1, 1]} : vector<2x128xf32> to vector<2x32xf32>
    %204 = vector.extract_strided_slice %199 {offsets = [0, 96], sizes = [2, 32], strides = [1, 1]} : vector<2x128xf32> to vector<2x32xf32>
    %205 = arith.mulf %202, %189 : vector<2x32xf32>
    %206 = arith.mulf %201, %203 : vector<2x32xf32>
    %207 = arith.addf %205, %206 : vector<2x32xf32>
    %208 = math.tanh %207 : vector<2x32xf32>
    %209 = arith.mulf %204, %208 : vector<2x32xf32>
    %c6_i32 = arith.constant 6 : i32
    %210 = vector.broadcast %c6_i32 : i32 to vector<2x1xi32>
    %211 = arith.cmpi sgt, %0, %210 : vector<2x1xi32>
    %212 = vector.shape_cast %211 : vector<2x1xi1> to vector<2x1xi1>
    %213 = vector.broadcast %212 : vector<2x1xi1> to vector<2x32xi1>
    %214 = arith.select %213, %209, %186 : vector<2x32xi1>, vector<2x32xf32>
    %215 = vector.shape_cast %211 : vector<2x1xi1> to vector<2x1xi1>
    %216 = vector.broadcast %215 : vector<2x1xi1> to vector<2x32xi1>
    %217 = arith.select %216, %207, %189 : vector<2x32xi1>, vector<2x32xf32>
    %218 = arith.truncf %214 : vector<2x32xf32> to vector<2x32xbf16>
    %cst_32 = arith.constant dense<0.000000e+00> : vector<2x128xf32>
    %219 = tpu.matmul %218, %19, %cst_32 {dimension_numbers = #tpu.dot_dimension_numbers<[1], [0], [0], [1], [0, 0, 1, 1], [], []>} : vector<2x32xbf16>, vector<32x128xbf16>, vector<2x128xf32> -> vector<2x128xf32>
    %220 = vector.extract_strided_slice %17 {offsets = [14, 0], sizes = [2, 128], strides = [1, 1]} : vector<16x128xf32> to vector<2x128xf32>
    %221 = arith.addf %220, %219 : vector<2x128xf32>
    %cst_33 = arith.constant 0.000000e+00 : f32
    %222 = vector.broadcast %cst_33 : f32 to vector<2x128xf32>
    %223 = arith.subf %222, %221 : vector<2x128xf32>
    %224 = math.exp %223 : vector<2x128xf32>
    %cst_34 = arith.constant 1.000000e+00 : f32
    %225 = vector.broadcast %cst_34 : f32 to vector<2x128xf32>
    %226 = arith.addf %225, %224 : vector<2x128xf32>
    %227 = tpu.reciprocal %226 {approx = true} : vector<2x128xf32> -> vector<2x128xf32>
    %228 = math.tanh %221 : vector<2x128xf32>
    %229 = vector.extract_strided_slice %227 {offsets = [0, 0], sizes = [2, 32], strides = [1, 1]} : vector<2x128xf32> to vector<2x32xf32>
    %230 = vector.extract_strided_slice %227 {offsets = [0, 32], sizes = [2, 32], strides = [1, 1]} : vector<2x128xf32> to vector<2x32xf32>
    %231 = vector.extract_strided_slice %228 {offsets = [0, 64], sizes = [2, 32], strides = [1, 1]} : vector<2x128xf32> to vector<2x32xf32>
    %232 = vector.extract_strided_slice %227 {offsets = [0, 96], sizes = [2, 32], strides = [1, 1]} : vector<2x128xf32> to vector<2x32xf32>
    %233 = arith.mulf %230, %217 : vector<2x32xf32>
    %234 = arith.mulf %229, %231 : vector<2x32xf32>
    %235 = arith.addf %233, %234 : vector<2x32xf32>
    %236 = math.tanh %235 : vector<2x32xf32>
    %237 = arith.mulf %232, %236 : vector<2x32xf32>
    %c7_i32 = arith.constant 7 : i32
    %238 = vector.broadcast %c7_i32 : i32 to vector<2x1xi32>
    %239 = arith.cmpi sgt, %0, %238 : vector<2x1xi32>
    %240 = vector.shape_cast %239 : vector<2x1xi1> to vector<2x1xi1>
    %241 = vector.broadcast %240 : vector<2x1xi1> to vector<2x32xi1>
    %242 = arith.select %241, %237, %214 : vector<2x32xi1>, vector<2x32xf32>
    %c232 = arith.constant 232 : index
    %c0_35 = arith.constant 0 : index
    %243 = vector.load %arg3[%c232, %c0_35] : memref<272x128xf32, #tpu.memory_space<vmem>>, vector<32x128xf32>
    %244 = arith.truncf %243 : vector<32x128xf32> to vector<32x128xbf16>
    %c264 = arith.constant 264 : index
    %c0_36 = arith.constant 0 : index
    %245 = vector.load %arg3[%c264, %c0_36] : memref<272x128xf32, #tpu.memory_space<vmem>>, vector<1x128xf32>
    %246 = arith.truncf %242 : vector<2x32xf32> to vector<2x32xbf16>
    %cst_37 = arith.constant dense<0.000000e+00> : vector<2x128xf32>
    %247 = tpu.matmul %246, %244, %cst_37 {dimension_numbers = #tpu.dot_dimension_numbers<[1], [0], [0], [1], [0, 0, 1, 1], [], []>} : vector<2x32xbf16>, vector<32x128xbf16>, vector<2x128xf32> -> vector<2x128xf32>
    %248 = vector.broadcast %245 : vector<1x128xf32> to vector<2x128xf32>
    %249 = arith.addf %247, %248 : vector<2x128xf32>
    %250 = vector.extract_strided_slice %249 {offsets = [0, 0], sizes = [2, 18], strides = [1, 1]} : vector<2x128xf32> to vector<2x18xf32>
    %cst_38 = arith.constant dense<0xFF800000> : vector<2xf32>
    %251 = vector.multi_reduction <maximumf>, %250, %cst_38 [1] : vector<2x18xf32> to vector<2xf32>
    %252 = vector.shape_cast %251 : vector<2xf32> to vector<2x1xf32>
    %253 = vector.broadcast %252 : vector<2x1xf32> to vector<2x18xf32>
    %254 = arith.subf %250, %253 : vector<2x18xf32>
    %255 = math.exp %254 : vector<2x18xf32>
    %cst_39 = arith.constant dense<0.000000e+00> : vector<2xf32>
    %256 = vector.multi_reduction <add>, %255, %cst_39 [1] : vector<2x18xf32> to vector<2xf32>
    %257 = vector.shape_cast %256 : vector<2xf32> to vector<2x1xf32>
    %258 = math.log %257 : vector<2x1xf32>
    %259 = vector.broadcast %258 : vector<2x1xf32> to vector<2x18xf32>
    %260 = arith.subf %254, %259 : vector<2x18xf32>
    %c0_40 = arith.constant 0 : index
    %c0_41 = arith.constant 0 : index
    %261 = vector.load %arg4[%c0_40, %c0_41] : memref<2x18xf32, #tpu.memory_space<vmem>>, vector<2x18xf32>
    tpu.vector_store %arg4[%c0_40, %c0_41], %260 {strides = array<i32>} : memref<2x18xf32, #tpu.memory_space<vmem>>, vector<2x18xf32>,
    return
  }
  func.func @transform_0(%arg0: i32) -> (i32, i32) {
    %c0_i32 = arith.constant 0 : i32
    %c0_i32_0 = arith.constant 0 : i32
    %c0_i32_1 = arith.constant 0 : i32
    return %c0_i32, %c0_i32_0 : i32, i32
  }
  func.func @transform_1(%arg0: i32) -> (i32, i32) {
    %c0_i32 = arith.constant 0 : i32
    %c0_i32_0 = arith.constant 0 : i32
    %c0_i32_1 = arith.constant 0 : i32
    return %c0_i32, %c0_i32_0 : i32, i32
  }
  func.func @transform_2(%arg0: i32) -> (i32, i32) {
    %c0_i32 = arith.constant 0 : i32
    %c0_i32_0 = arith.constant 0 : i32
    %c0_i32_1 = arith.constant 0 : i32
    return %c0_i32, %c0_i32_0 : i32, i32
  }
  func.func @transform_3(%arg0: i32) -> (i32, i32) {
    %c0_i32 = arith.constant 0 : i32
    %c0_i32_0 = arith.constant 0 : i32
    %c0_i32_1 = arith.constant 0 : i32
    return %c0_i32, %c0_i32_0 : i32, i32
  }
}

</mosaic_0001>

<bundles_post_ra>
// kernel: pack_padded_lstm_forward.1
= control target key start
LH: loop header
LB: loop body
LE: loop exit
PB: predicated region body
PF: predicated region fallthrough
CT: control target
= control target key end

     0   :  { %v1290_v5 = vmov 0   ;;  %s1598_s0 = inlined_call_operand.vmem [shape: s32[16,1], index: 0, kind: input, shape index: {}]   ;;  %s1599_s1 = inlined_call_operand.vmem [shape: s32[2,1], index: 1, kind: input, shape index: {}]   ;;  %s1600_s2 = inlined_call_operand.vmem [shape: f32[272,128], index: 2, kind: input, shape index: {}]   ;;  %s1601_s3 = inlined_call_operand.hbm [shape: f32[2,18], index: 3, kind: output, shape index: {}]  }
   0x1   :  { %v30_v0 = vld [vmem:[%s1600_s2 + $0x40] sm:$0xff]  ;;  %v31_v1 = vld [vmem:[%s1600_s2 + $0x48] sm:$0xff]  ;;  %v32_v2 = vld [vmem:[%s1600_s2 + $0x50] sm:$0xff]  ;;  %1186 = vset.pattern.permute.xlu0 %v1290_v5  ;;  %1192 = vset.pattern.permute.xlu1 %v1290_v5 }
   0x2   :  { %v46_v3 = vpack.c.bf16 %v31_v1, %v30_v0  ;;  %v33_v4 = vld [vmem:[%s1600_s2 + $0x58] sm:$0xff]  ;;  %v34_v7 = vld [vmem:[%s1600_s2 + $0x60] sm:$0xff]  ;;  %v35_v8 = vld [vmem:[%s1600_s2 + $0x68] sm:$0xff] }
   0x3   :  { %v47_v6 = vpack.c.bf16 %v33_v4, %v32_v2  ;;  %v48_v9 = vpack.c.bf16 %v35_v8, %v34_v7  ;;  %v18_v10 = vld [vmem:[%s1600_s2] sm:$0xff]  ;;  %v19_v11 = vld [vmem:[%s1600_s2 + $0x8] sm:$0xff]  ;;  %v36_v12 = vld [vmem:[%s1600_s2 + $0x70] sm:$0xff] }
   0x4   :  { %1070 = vmatprep.subr.bf16.mxu0 %v46_v3  ;;  %v37_v13 = vld [vmem:[%s1600_s2 + $0x78] sm:$0xff]  ;;  %v26_v14 = vpack.c.bf16 %v19_v11, %v18_v10  ;;  %v119_v15 = vld [vmem:[%s1598_s0] sm:$0xff] }
   0x5   :  { %1071 = vmatpush3.bf16.msra.mxu0 %v46_v3  ;;  %v1356_v16 = vld [vmem:[%s1599_s1] sm:$0x3]  ;;  %v49_v17 = vpack.c.bf16 %v37_v13, %v36_v12  ;;  %124 = vperm.xlu0 %1186, %v119_v15  }
   0x6   :  { %1072 = vmatprep.subr.bf16.mxu0 %v47_v6  ;;  %1086 = vmatprep.mubr.bf16.mxu0 %v26_v14 }
   0x9   :  { %1073 = vmatpush3.bf16.msra.mxu0 %v47_v6 }
   0xa   :  { %1074 = vmatprep.subr.bf16.mxu0 %v48_v9 }
   0xb   :  { %8 = vsyncpa [#allocation3], 0  ;;  %v38_v18 = vld [vmem:[%s1600_s2 + $0x80] sm:$0xff]  ;;  %v39_v19 = vld [vmem:[%s1600_s2 + $0x88] sm:$0xff]  ;;  %vm263_vm0 = vcmp.gt.s32.totalorder %v1356_v16, 0  ;;  %v1291_v41 = vmov 0.0   ;;  %v121_v54 = vlaneseq }
   0xc   :  { %v120_v20 = vld [vmem:[%s1598_s0 + $0x8] sm:$0xff]  ;;  %v50_v21 = vpack.c.bf16 %v39_v19, %v38_v18  ;;  %v40_v22 = vld [vmem:[%s1600_s2 + $0x90] sm:$0xff]  ;;  %v41_v23 = vld [vmem:[%s1600_s2 + $0x98] sm:$0xff]  ;;  %v264_v24 = vsel %vm263_vm0, 1, %v1290_v5  ;;  %1094 = vmatprep.subr.bf16.mxu1 %v1291_v41  ;;  %vm1292_vm1 = vmmov 0   ;;  %vm145_vm4 = vcmask 523264  }
   0xd   :  { %1075 = vmatpush3.bf16.msra.mxu0 %v48_v9  ;;  %127 = vperm.xlu0 %1186, %v120_v20   ;;  %v51_v25 = vpack.c.bf16 %v41_v23, %v40_v22  ;;  %v42_v26 = vld [vmem:[%s1600_s2 + $0xa0] sm:$0xff]  ;;  %v43_v27 = vld [vmem:[%s1600_s2 + $0xa8] sm:$0xff]  ;;  %v44_v29 = vld [vmem:[%s1600_s2 + $0xb0] sm:$0xff]  ;;  %v122_v57 = vand.u32 127, %v121_v54  ;;  %vm196_vm5 = vcmask 261120   ;;  %s1294_s18 = smov 64  }
   0xe   :  { %1076 = vmatprep.subr.bf16.mxu0 %v49_v17  ;;  %v52_v28 = vpack.c.bf16 %v43_v27, %v42_v26  ;;  %v45_v30 = vld [vmem:[%s1600_s2 + $0xb8] sm:$0xff]  ;;  %v20_v32 = vld [vmem:[%s1600_s2 + $0x10] sm:$0xff]  ;;  %v22_v34 = vld [vmem:[%s1600_s2 + $0x20] sm:$0xff]  ;;  %1102 = vmatprep.mubr.msk.bf16.mxu1 %vm1292_vm1, %v1291_v41  ;;  %v1293_v3 = vmov 1065369472   ;;  %s1295_s19 = smov 32  }
   0xf   :  { %v53_v31 = vpack.c.bf16 %v45_v30, %v44_v29  ;;  %v21_v33 = vld [vmem:[%s1600_s2 + $0x18] sm:$0xff]  ;;  %v23_v35 = vld [vmem:[%s1600_s2 + $0x28] sm:$0xff]  ;;  %v24_v38 = vld [vmem:[%s1600_s2 + $0x30] sm:$0xff]  ;;  %vm348_vm7 = vcmp.gt.s32.totalorder %v1356_v16, 1  ;;  %s1296_s20 = smov 96   ;;  %vm449_vm9 = vcmp.gt.s32.totalorder %v1356_v16, 2 }
  0x10   :  { %v27_v36 = vpack.c.bf16 %v21_v33, %v20_v32  ;;  %v28_v37 = vpack.c.bf16 %v23_v35, %v22_v34  ;;  %v25_v39 = vld [vmem:[%s1600_s2 + $0x38] sm:$0xff]  ;;  %v190_v42 = vld [vmem:[%s1600_s2 + $0xc0] sm:$0xff]  ;;  %v191_v43 = vld [vmem:[%s1600_s2 + $0xc8] sm:$0xff]  ;;  %vm543_vm11 = vcmp.gt.s32.totalorder %v1356_v16, 3  ;;  %vm633_vm13 = vcmp.gt.s32.totalorder %v1356_v16, 4 }
  0x11   :  { %1077 = vmatpush3.bf16.msra.mxu0 %v49_v17  ;;  %266 = vperm.xlu0 %1186, %v264_v24   ;;  %v29_v40 = vpack.c.bf16 %v25_v39, %v24_v38  ;;  %v1417_v44 = vpack.c.bf16 %v191_v43, %v190_v42  ;;  %v192_v45 = vld [vmem:[%s1600_s2 + $0xd0] sm:$0xff]  ;;  %v193_v46 = vld [vmem:[%s1600_s2 + $0xd8] sm:$0xff]  ;;  %v1014_v7 = vld [vmem:[%s1600_s2 + $0xe0] ss:$0 sm:$0xff]  ;;  %vm722_vm15 = vcmp.gt.s32.totalorder %v1356_v16, 5 }
  0x12   :  { %1078 = vmatprep.subr.bf16.mxu0 %v50_v21  ;;  %v1427_v47 = vpack.c.bf16 %v193_v46, %v192_v45 }
  0x15   :  { %1079 = vmatpush3.bf16.msra.mxu0 %v50_v21 }
  0x16   :  { %1080 = vmatprep.subr.bf16.mxu0 %v51_v25 }
  0x19   :  { %1081 = vmatpush3.bf16.msra.mxu0 %v51_v25 }
  0x1a   :  { %1082 = vmatprep.subr.bf16.mxu0 %v52_v28 }
  0x1d   :  { %1083 = vmatpush3.bf16.msra.mxu0 %v52_v28 }
  0x1e   :  { %1084 = vmatprep.subr.bf16.mxu0 %v53_v31 }
  0x21   :  { %1085 = vmatpush3.bf16.msra.mxu0 %v53_v31 }
  0x22   :  { %1130 = vmatprep.subr.bf16.mxu0 %v1291_v41 }
  0x24   :  { %1087 = vmatmul.mubr.bf16.vlgmr.msra.gmra.mrb[0].mxu0 %v27_v36 }
  0x25   :  { %1090 = vmatprep.mubr.bf16.mxu0 %v28_v37  ;;  %1131 = vmatpush3.bf16.msra.mxu0 %v1417_v44 }
  0x26   :  { %1132 = vmatprep.subr.bf16.mxu0 %v1291_v41 }
  0x29   :  { %1133 = vmatpush3.bf16.msra.mxu0 %v1427_v47 }
  0x2a   :  { %1146 = vmatprep.subr.bf16.mxu0 %v1291_v41 }
  0x2c   :  { %1091 = vmatmul.mubr.bf16.gmra.mrb[4].mxu0 %v29_v40 }
  0x2d   :  { %1134 = vmatprep.mubr.msk.bf16.mxu0 %vm1292_vm1, %v1291_v41 }
  0x84   :  { %v125_v55 = vpop.permute.xlu0 %124 }
  0x85   :  { %vm129_vm2 = vcmp.eq.s32.totalorder %v122_v57, %v125_v55 }
  0x86   :  { %v1012_v0 = vsel %vm129_vm2, 1.0, %v1291_v41 }
  0x8c   :  { %v128_v62 = vpop.permute.xlu0 %127 }
  0x8d   :  { %vm130_vm3 = vcmp.eq.s32.totalorder %v122_v57, %v128_v62 }
  0x8e   :  { %v1013_v1 = vsel %vm130_vm3, 1.0, %v1291_v41  ;;  %vm917_vm3 = vcmp.gt.s32.totalorder %v1356_v16, 7 }
  0x8f   :  { %v135_v2 = vpack.c.bf16 %v1013_v1, %v1012_v0 }
  0x90   :  { %v267_v29 = vpop.permute.xlu0 %266 }
  0x91   :  { %vm268_vm6 = vcmp.eq.s32.totalorder %v267_v29, 1 }
  0xf7   :  { %v1088_v48 = vpop.f32.mrb[0].mxu0 }
  0xf8   :  { %v88_v49 = vpop.f32.mrb[1].mxu0 }
  0xf9   :  { %v1089_v50 = vpop.f32.mrb[2].mxu0 }
  0xfa   :  { %v138_v51 = vpack.c.bf16 %v1089_v50, %v1088_v48  ;;  %v91_v52 = vpop.f32.mrb[3].mxu0 }
  0xfb   :  { %v137_v53 = vpack.c.bf16 %v91_v52, %v88_v49  ;;  %v349_v52 = vsel %vm348_vm7, 1, %v1290_v5 }
  0xfd   :  { %1095 = vmatpush3.bf16.msra.mxu1 %v137_v53 }
  0xfe   :  { %1096 = vmatprep.subr.bf16.mxu1 %v1291_v41 }
  0xff   :  { %v1092_v56 = vpop.f32.mrb[4].mxu0 }
 0x100   :  { %v104_v58 = vpop.f32.mrb[5].mxu0 }
 0x101   :  { %v1093_v59 = vpop.f32.mrb[6].mxu0  ;;  %1097 = vmatpush3.bf16.msra.mxu1 %v138_v51 }
 0x102   :  { %v140_v60 = vpack.c.bf16 %v1093_v59, %v1092_v56  ;;  %v107_v61 = vpop.f32.mrb[7].mxu0  ;;  %1098 = vmatprep.subr.bf16.mxu1 %v1291_v41 }
 0x103   :  { %v139_v63 = vpack.c.bf16 %v107_v61, %v104_v58 }
 0x105   :  { %1099 = vmatpush3.bf16.msra.mxu1 %v139_v63 }
 0x106   :  { %1100 = vmatprep.subr.bf16.mxu1 %v1291_v41 }
 0x109   :  { %1101 = vmatpush3.bf16.msra.mxu1 %v140_v60 }
 0x10a   :  { %1106 = vmatprep.subr.bf16.mxu1 %v1291_v41 }
 0x10c   :  { %1103 = vmatmul.mubr.msk.bf16.vlgmr.msra.gmra.mrb[0].mxu1 %vm145_vm4, %v135_v2 }
 0x10d   :  { %1107 = vmatpush3.bf16.msra.mxu1 %v1417_v44  ;;  %1110 = vmatprep.mubr.msk.bf16.mxu1 %vm1292_vm1, %v1291_v41 }
 0x10e   :  { %1108 = vmatprep.subr.bf16.mxu1 %v1291_v41 }
 0x111   :  { %1109 = vmatpush3.bf16.msra.mxu1 %v1427_v47 }
 0x112   :  { %1114 = vmatprep.subr.bf16.mxu1 %v1291_v41 }
 0x114   :  { %1111 = vmatmul.mubr.msk.bf16.vlgmr.msra.gmra.mrb[4].mxu1 %vm196_vm5, %v1293_v3 }
 0x115   :  { %1115 = vmatpush3.bf16.msra.mxu1 %v1417_v44  ;;  %1118 = vmatprep.mubr.msk.bf16.mxu1 %vm1292_vm1, %v1291_v41 }
 0x116   :  { %1116 = vmatprep.subr.bf16.mxu1 %v1291_v41 }
 0x119   :  { %1117 = vmatpush3.bf16.msra.mxu1 %v1427_v47 }
 0x11a   :  { %1122 = vmatprep.subr.bf16.mxu1 %v1291_v41 }
 0x1df   :  { %v183_v4 = vpop.f32.mrb[0].mxu1 }
 0x1e0   :  { %v1104_v6 = vpop.f32.mrb[1].mxu1  ;;  %v1455_v11 = vadd.f32 %v1014_v7, %v183_v4 }
 0x1e1   :  { %v186_v8 = vpop.f32.mrb[2].mxu1 }
 0x1e2   :  { %v1453_v9 = vadd.f32 %v1014_v7, %v186_v8  ;;  %v1105_v10 = vpop.f32.mrb[3].mxu1 }
 0x1e7   :  { %v234_v12 = vpop.f32.mrb[4].mxu1 }
 0x1e8   :  { %v240_v13 = vadd.f32 %v234_v12, %v1455_v11  ;;  %v1112_v14 = vpop.f32.mrb[5].mxu1 }
 0x1e9   :  { %v237_v15 = vpop.f32.mrb[6].mxu1 }
 0x1ea   :  { %1198 = vtanh.f32 %v240_v13  ;;  %v1113_v17 = vpop.f32.mrb[7].mxu1  ;;  %v241_v19 = vsub.f32 0.0, %v240_v13 }
 0x1ec   :  { %v242_v20 = vmul.f32 1.442695, %v241_v19 }
 0x1ee   :  { %1200 = vpow2.f32 %v242_v20 }
 0x1f4   :  { %v1199_v18 = vpop.eup %1198 }
 0x1f5   :  { %248 = vrot.lane.b32.xlu1 %v1199_v18, %s1294_s18 }
 0x1f8   :  { %v1201_v21 = vpop.eup %1200 }
 0x1f9   :  { %v244_v22 = vadd.f32 1.0, %v1201_v21 }
 0x1fb   :  { %1202 = vrcp.f32 %v244_v22 }
 0x205   :  { %v1203_v23 = vpop.eup %1202 }
 0x267   :  { %v249_v24 = vpop.permute.xlu1 %248 }
 0x268   :  { %v251_v25 = vmul.f32 %v1203_v23, %v249_v24 }
 0x26a   :  { %253 = vrot.lane.b32.xlu1 %v251_v25, %s1295_s19 }
 0x2dc   :  { %v254_v26 = vpop.permute.xlu1 %253 }
 0x2dd   :  { %v256_v27 = vadd.f32 %v1203_v23, %v254_v26 }
 0x2df   :  { %1204 = vtanh.f32 %v256_v27  ;;  %v270_v53 = vsel %vm268_vm6, %v256_v27, 1.0 }
 0x2e0   :  { %v329_v54 = vrot.slane %v270_v53, 6 }
 0x2e9   :  { %v1205_v28 = vpop.eup %1204 }
 0x2ea   :  { %259 = vrot.lane.b32.xlu1 %v1205_v28, %s1294_s18  ;;  %v450_v28 = vsel %vm449_vm9, 1, %v1290_v5 }
 0x35c   :  { %v260_v30 = vpop.permute.xlu1 %259 }
 0x35d   :  { %v262_v31 = vmul.f32 %v1203_v23, %v260_v30 }
 0x35f   :  { %v269_v32 = vsel %vm268_vm6, %v262_v31, 1.0  ;;  %vm984_vm6 = vcmask 140288  }
 0x360   :  { %v271_v33 = vpack.c.bf16 %v269_v32, %v269_v32 }
 0x362   :  { %273 = vrot.lane.b32.xlu0 %v271_v33, %s1295_s19 }
 0x3d4   :  { %v274_v34 = vpop.permute.xlu0 %273 }
 0x3d5   :  { %1119 = vmatmul.mubr.msk.bf16.vlgmr.msra.gmra.mrb[8].mxu1 %vm196_vm5, %v274_v34 }
 0x3d6   :  { %1123 = vmatpush3.bf16.msra.mxu1 %v1417_v44  ;;  %1126 = vmatprep.mubr.msk.bf16.mxu1 %vm1292_vm1, %v1291_v41 }
 0x3d7   :  { %1124 = vmatprep.subr.bf16.mxu1 %v1291_v41 }
 0x3da   :  { %1125 = vmatpush3.bf16.msra.mxu1 %v1427_v47 }
 0x3db   :  { %1138 = vmatprep.subr.bf16.mxu1 %v1291_v41 }
 0x4a8   :  { %v312_v35 = vpop.f32.mrb[8].mxu1 }
 0x4a9   :  { %v319_v36 = vrot.slane %v312_v35, 6  ;;  %v1120_v37 = vpop.f32.mrb[9].mxu1 }
 0x4aa   :  { %v315_v38 = vpop.f32.mrb[10].mxu1 }
 0x4ab   :  { %v321_v39 = vadd.f32 %v319_v36, %v1455_v11  ;;  %v1121_v40 = vpop.f32.mrb[11].mxu1 }
 0x4ad   :  { %1206 = vtanh.f32 %v321_v39  ;;  %v322_v43 = vsub.f32 0.0, %v321_v39 }
 0x4af   :  { %v323_v45 = vmul.f32 1.442695, %v322_v43 }
 0x4b1   :  { %1208 = vpow2.f32 %v323_v45 }
 0x4b7   :  { %v1207_v42 = vpop.eup %1206 }
 0x4b8   :  { %333 = vrot.lane.b32.xlu1 %v1207_v42, %s1294_s18 }
 0x4bb   :  { %v1209_v46 = vpop.eup %1208 }
 0x4bc   :  { %v325_v48 = vadd.f32 1.0, %v1209_v46 }
 0x4be   :  { %1210 = vrcp.f32 %v325_v48 }
 0x4c8   :  { %v1211_v49 = vpop.eup %1210 }
 0x4c9   :  { %v331_v55 = vmul.f32 %v1211_v49, %v329_v54 }
 0x52a   :  { %v334_v50 = vpop.permute.xlu1 %333 }
 0x52b   :  { %v336_v51 = vmul.f32 %v1211_v49, %v334_v50 }
 0x52d   :  { %338 = vrot.lane.b32.xlu0 %v336_v51, %s1295_s19 }
 0x531   :  { %351 = vperm.xlu0 %1186, %v349_v52  }
 0x59f   :  { %v339_v56 = vpop.permute.xlu0 %338 }
 0x5a0   :  { %v341_v57 = vadd.f32 %v339_v56, %v331_v55 }
 0x5a2   :  { %1212 = vtanh.f32 %v341_v57  ;;  %v365_v58 = vrot.slane %v341_v57, 2 }
 0x5a4   :  { %366 = vrot.lane.b32.xlu0 %v365_v58, %s1296_s20 }
 0x5ac   :  { %v1213_v59 = vpop.eup %1212 }
 0x5ad   :  { %344 = vrot.lane.b32.xlu1 %v1213_v59, %s1294_s18 }
 0x5b0   :  { %v352_v0 = vpop.permute.xlu0 %351 }
 0x5b1   :  { %vm353_vm8 = vcmp.eq.s32.totalorder %v352_v0, 1 }
 0x616   :  { %v367_v6 = vpop.permute.xlu0 %366 }
 0x61f   :  { %v345_v60 = vpop.permute.xlu1 %344 }
 0x620   :  { %v347_v61 = vmul.f32 %v1211_v49, %v345_v60 }
 0x622   :  { %v355_v62 = vrot.slane %v347_v61, 2 }
 0x624   :  { %v1187_v63 = vpack.i.bf16 %v269_v32, %v355_v62 }
 0x626   :  { %1188 = vrot.lane.b32.xlu1 %v1187_v63, %s1295_s19 }
 0x62a   :  { %369 = vrot.lane.b32.xlu1 %v270_v53, %s1296_s20 }
 0x698   :  { %v1189_v1 = vpop.permute.xlu1 %1188 }
 0x699   :  { %v1191_v2 = vunpack.i.h.bf16 %v1189_v1  ;;  %v1190_v3 = vunpack.i.l.bf16 %v1189_v1 }
 0x69b   :  { %v363_v4 = vsel %vm353_vm8, %v1190_v3, %v1191_v2 }
 0x69c   :  { %v373_v7 = vpack.c.bf16 %v363_v4, %v363_v4  ;;  %v370_v8 = vpop.permute.xlu1 %369 }
 0x69d   :  { %v372_v10 = vsel %vm353_vm8, %v367_v6, %v370_v8  ;;  %v634_v8 = vsel %vm633_vm13, 1, %v1290_v5 }
 0x69e   :  { %v428_v12 = vrot.slane %v372_v10, 4  ;;  %1127 = vmatmul.mubr.msk.bf16.vlgmr.msra.gmra.mrb[12].mxu1 %vm196_vm5, %v373_v7 }
 0x69f   :  { %1139 = vmatpush3.bf16.msra.mxu1 %v1417_v44  ;;  %1142 = vmatprep.mubr.msk.bf16.mxu1 %vm1292_vm1, %v1291_v41 }
 0x6a0   :  { %429 = vrot.lane.b32.xlu1 %v428_v12, %s1295_s19  ;;  %1140 = vmatprep.subr.bf16.mxu1 %v1291_v41 }
 0x6a3   :  { %1141 = vmatpush3.bf16.msra.mxu1 %v1427_v47 }
 0x6a4   :  { %1154 = vmatprep.subr.bf16.mxu1 %v1291_v41 }
 0x712   :  { %v430_v29 = vpop.permute.xlu1 %429 }
 0x771   :  { %v411_v13 = vpop.f32.mrb[12].mxu1 }
 0x772   :  { %v418_v14 = vrot.slane %v411_v13, 4  ;;  %v1128_v15 = vpop.f32.mrb[13].mxu1 }
 0x773   :  { %v414_v17 = vpop.f32.mrb[14].mxu1 }
 0x774   :  { %v420_v18 = vadd.f32 %v418_v14, %v1455_v11  ;;  %v1129_v19 = vpop.f32.mrb[15].mxu1 }
 0x776   :  { %1214 = vtanh.f32 %v420_v18  ;;  %v421_v21 = vsub.f32 0.0, %v420_v18 }
 0x778   :  { %v422_v22 = vmul.f32 1.442695, %v421_v21 }
 0x77a   :  { %1216 = vpow2.f32 %v422_v22 }
 0x780   :  { %v1215_v20 = vpop.eup %1214 }
 0x781   :  { %434 = vrot.lane.b32.xlu0 %v1215_v20, %s1294_s18 }
 0x784   :  { %v1217_v23 = vpop.eup %1216 }
 0x785   :  { %v424_v24 = vadd.f32 1.0, %v1217_v23 }
 0x787   :  { %1218 = vrcp.f32 %v424_v24 }
 0x791   :  { %v1219_v25 = vpop.eup %1218 }
 0x792   :  { %v432_v30 = vmul.f32 %v1219_v25, %v430_v29 }
 0x7f3   :  { %v435_v26 = vpop.permute.xlu0 %434 }
 0x7f4   :  { %v437_v27 = vmul.f32 %v1219_v25, %v435_v26 }
 0x7f6   :  { %439 = vrot.lane.b32.xlu0 %v437_v27, %s1295_s19 }
 0x7fa   :  { %452 = vperm.xlu0 %1186, %v450_v28  }
 0x868   :  { %v440_v31 = vpop.permute.xlu0 %439 }
 0x869   :  { %v442_v32 = vadd.f32 %v440_v31, %v432_v30 }
 0x86b   :  { %1220 = vtanh.f32 %v442_v32  ;;  %v462_v33 = vrot.slane %v442_v32, 4 }
 0x86d   :  { %463 = vrot.lane.b32.xlu0 %v462_v33, %s1296_s20 }
 0x875   :  { %v1221_v34 = vpop.eup %1220 }
 0x876   :  { %445 = vrot.lane.b32.xlu1 %v1221_v34, %s1294_s18 }
 0x879   :  { %v453_v35 = vpop.permute.xlu0 %452 }
 0x87a   :  { %vm454_vm10 = vcmp.eq.s32.totalorder %v453_v35, 1 }
 0x8df   :  { %v464_v36 = vpop.permute.xlu0 %463 }
 0x8e0   :  { %v466_v37 = vsel %vm454_vm10, %v464_v36, %v372_v10 }
 0x8e1   :  { %v522_v38 = vrot.slane %v466_v37, 2 }
 0x8e3   :  { %523 = vrot.lane.b32.xlu0 %v522_v38, %s1295_s19 }
 0x8e8   :  { %v446_v39 = vpop.permute.xlu1 %445 }
 0x8e9   :  { %v448_v40 = vmul.f32 %v1219_v25, %v446_v39 }
 0x8eb   :  { %v456_v42 = vrot.slane %v448_v40, 4 }
 0x8ed   :  { %457 = vrot.lane.b32.xlu1 %v456_v42, %s1295_s19 }
 0x955   :  { %v524_v62 = vpop.permute.xlu0 %523 }
 0x95f   :  { %v458_v43 = vpop.permute.xlu1 %457 }
 0x960   :  { %v460_v45 = vsel %vm454_vm10, %v458_v43, %v363_v4 }
 0x961   :  { %v467_v46 = vpack.c.bf16 %v460_v45, %v460_v45 }
 0x963   :  { %1135 = vmatmul.mubr.msk.bf16.vlgmr.msra.gmra.mrb[8].mxu0 %vm196_vm5, %v467_v46 }
 0x964   :  { %1147 = vmatpush3.bf16.msra.mxu0 %v1417_v44  ;;  %1150 = vmatprep.mubr.msk.bf16.mxu0 %vm1292_vm1, %v1291_v41 }
 0x965   :  { %1148 = vmatprep.subr.bf16.mxu0 %v1291_v41 }
 0x968   :  { %1149 = vmatpush3.bf16.msra.mxu0 %v1427_v47 }
 0x969   :  { %1162 = vmatprep.subr.bf16.mxu0 %v1291_v41 }
 0xa36   :  { %v505_v48 = vpop.f32.mrb[8].mxu0 }
 0xa37   :  { %v512_v49 = vrot.slane %v505_v48, 2  ;;  %v1136_v50 = vpop.f32.mrb[9].mxu0 }
 0xa38   :  { %v508_v51 = vpop.f32.mrb[10].mxu0 }
 0xa39   :  { %v514_v52 = vadd.f32 %v512_v49, %v1455_v11  ;;  %v1137_v53 = vpop.f32.mrb[11].mxu0  ;;  %v544_v11 = vsel %vm543_vm11, 1, %v1290_v5 }
 0xa3b   :  { %1222 = vtanh.f32 %v514_v52  ;;  %v515_v55 = vsub.f32 0.0, %v514_v52 }
 0xa3d   :  { %v516_v56 = vmul.f32 1.442695, %v515_v55 }
 0xa3f   :  { %1224 = vpow2.f32 %v516_v56 }
 0xa45   :  { %v1223_v54 = vpop.eup %1222 }
 0xa46   :  { %528 = vrot.lane.b32.xlu1 %v1223_v54, %s1294_s18 }
 0xa49   :  { %v1225_v57 = vpop.eup %1224 }
 0xa4a   :  { %v518_v58 = vadd.f32 1.0, %v1225_v57 }
 0xa4c   :  { %1226 = vrcp.f32 %v518_v58  ;;  %v723_v58 = vsel %vm722_vm15, 1, %v1290_v5 }
 0xa56   :  { %v1227_v59 = vpop.eup %1226 }
 0xa57   :  { %v526_v63 = vmul.f32 %v1227_v59, %v524_v62 }
 0xab8   :  { %v529_v60 = vpop.permute.xlu1 %528 }
 0xab9   :  { %v531_v61 = vmul.f32 %v1227_v59, %v529_v60 }
 0xabb   :  { %533 = vrot.lane.b32.xlu1 %v531_v61, %s1295_s19 }
 0xabf   :  { %546 = vperm.xlu1 %1192, %v544_v11  }
 0xb2d   :  { %v534_v0 = vpop.permute.xlu1 %533 }
 0xb2e   :  { %v536_v1 = vadd.f32 %v534_v0, %v526_v63 }
 0xb30   :  { %1228 = vtanh.f32 %v536_v1  ;;  %v556_v2 = vrot.slane %v536_v1, 6 }
 0xb32   :  { %557 = vrot.lane.b32.xlu1 %v556_v2, %s1296_s20 }
 0xb3a   :  { %v1229_v3 = vpop.eup %1228 }
 0xb3b   :  { %539 = vrot.lane.b32.xlu0 %v1229_v3, %s1294_s18 }
 0xb3e   :  { %v547_v4 = vpop.permute.xlu1 %546 }
 0xb3f   :  { %vm548_vm12 = vcmp.eq.s32.totalorder %v547_v4, 1 }
 0xba4   :  { %v558_v6 = vpop.permute.xlu1 %557 }
 0xba5   :  { %v560_v7 = vsel %vm548_vm12, %v558_v6, %v466_v37 }
 0xba6   :  { %613 = vrot.lane.b32.xlu1 %v560_v7, %s1295_s19 }
 0xbaa   :  { %636 = vperm.xlu1 %1192, %v634_v8  }
 0xbad   :  { %v540_v10 = vpop.permute.xlu0 %539 }
 0xbae   :  { %v542_v12 = vmul.f32 %v1227_v59, %v540_v10 }
 0xbb0   :  { %v550_v13 = vrot.slane %v542_v12, 6 }
 0xbb2   :  { %551 = vrot.lane.b32.xlu0 %v550_v13, %s1295_s19 }
 0xc18   :  { %v614_v31 = vpop.permute.xlu1 %613 }
 0xc24   :  { %v552_v14 = vpop.permute.xlu0 %551 }
 0xc25   :  { %v554_v15 = vsel %vm548_vm12, %v552_v14, %v460_v45 }
 0xc26   :  { %640 = vrot.lane.b32.xlu1 %v554_v15, %s1296_s20  ;;  %v561_v17 = vpack.c.bf16 %v554_v15, %v554_v15 }
 0xc28   :  { %1143 = vmatmul.mubr.msk.bf16.vlgmr.msra.gmra.mrb[16].mxu1 %vm196_vm5, %v561_v17 }
 0xc29   :  { %1155 = vmatpush3.bf16.msra.mxu1 %v1417_v44  ;;  %1158 = vmatprep.mubr.msk.bf16.mxu1 %vm1292_vm1, %v1291_v41  ;;  %v637_v36 = vpop.permute.xlu1 %636 }
 0xc2a   :  { %1156 = vmatprep.subr.bf16.mxu1 %v1291_v41  ;;  %vm638_vm14 = vcmp.eq.s32.totalorder %v637_v36, 1 }
 0xc2d   :  { %1157 = vmatpush3.bf16.msra.mxu1 %v1427_v47 }
 0xc2e   :  { %1170 = vmatprep.subr.bf16.mxu1 %v1291_v41 }
 0xc98   :  { %v641_v39 = vpop.permute.xlu1 %640 }
 0xcfb   :  { %v599_v18 = vpop.f32.mrb[16].mxu1 }
 0xcfc   :  { %v605_v19 = vadd.f32 %v599_v18, %v1453_v9  ;;  %v1144_v20 = vpop.f32.mrb[17].mxu1 }
 0xcfd   :  { %v602_v21 = vpop.f32.mrb[18].mxu1 }
 0xcfe   :  { %1230 = vtanh.f32 %v605_v19  ;;  %v1145_v22 = vpop.f32.mrb[19].mxu1  ;;  %v606_v24 = vsub.f32 0.0, %v605_v19 }
 0xd00   :  { %v607_v25 = vmul.f32 1.442695, %v606_v24 }
 0xd02   :  { %1232 = vpow2.f32 %v607_v25 }
 0xd08   :  { %v1231_v23 = vpop.eup %1230 }
 0xd09   :  { %618 = vrot.lane.b32.xlu0 %v1231_v23, %s1294_s18 }
 0xd0c   :  { %v1233_v26 = vpop.eup %1232 }
 0xd0d   :  { %v609_v27 = vadd.f32 1.0, %v1233_v26 }
 0xd0f   :  { %1234 = vrcp.f32 %v609_v27 }
 0xd19   :  { %v1235_v28 = vpop.eup %1234 }
 0xd1a   :  { %v616_v32 = vmul.f32 %v1235_v28, %v614_v31 }
 0xd7b   :  { %v619_v29 = vpop.permute.xlu0 %618 }
 0xd7c   :  { %v621_v30 = vmul.f32 %v1235_v28, %v619_v29 }
 0xd7e   :  { %623 = vrot.lane.b32.xlu0 %v621_v30, %s1295_s19 }
 0xdf0   :  { %v624_v33 = vpop.permute.xlu0 %623 }
 0xdf1   :  { %v626_v34 = vadd.f32 %v624_v33, %v616_v32 }
 0xdf3   :  { %1236 = vtanh.f32 %v626_v34  ;;  %v644_v59 = vsel %vm638_vm14, %v626_v34, %v614_v31 }
 0xdf4   :  { %v703_v60 = vrot.slane %v644_v59, 6 }
 0xdfd   :  { %v1237_v35 = vpop.eup %1236 }
 0xdfe   :  { %629 = vrot.lane.b32.xlu0 %v1237_v35, %s1294_s18 }
 0xe70   :  { %v630_v37 = vpop.permute.xlu0 %629 }
 0xe71   :  { %v632_v38 = vmul.f32 %v1235_v28, %v630_v37 }
 0xe73   :  { %v643_v40 = vsel %vm638_vm14, %v632_v38, %v641_v39 }
 0xe74   :  { %v645_v42 = vpack.c.bf16 %v643_v40, %v643_v40 }
 0xe76   :  { %647 = vrot.lane.b32.xlu0 %v645_v42, %s1295_s19 }
 0xee8   :  { %v648_v43 = vpop.permute.xlu0 %647 }
 0xee9   :  { %1151 = vmatmul.mubr.msk.bf16.vlgmr.msra.gmra.mrb[12].mxu0 %vm196_vm5, %v648_v43 }
 0xeea   :  { %1163 = vmatpush3.bf16.msra.mxu0 %v1417_v44  ;;  %1166 = vmatprep.mubr.msk.bf16.mxu0 %vm1292_vm1, %v1291_v41 }
 0xeeb   :  { %1164 = vmatprep.subr.bf16.mxu0 %v1291_v41 }
 0xeee   :  { %1165 = vmatpush3.bf16.msra.mxu0 %v1427_v47 }
 0xfbc   :  { %v686_v45 = vpop.f32.mrb[12].mxu0 }
 0xfbd   :  { %v693_v46 = vrot.slane %v686_v45, 6  ;;  %v1152_v48 = vpop.f32.mrb[13].mxu0 }
 0xfbe   :  { %v689_v49 = vpop.f32.mrb[14].mxu0 }
 0xfbf   :  { %v695_v50 = vadd.f32 %v693_v46, %v1453_v9  ;;  %v1153_v51 = vpop.f32.mrb[15].mxu0 }
 0xfc1   :  { %1238 = vtanh.f32 %v695_v50  ;;  %v696_v53 = vsub.f32 0.0, %v695_v50 }
 0xfc3   :  { %v697_v44 = vmul.f32 1.442695, %v696_v53 }
 0xfc5   :  { %1240 = vpow2.f32 %v697_v44 }
 0xfcb   :  { %v1239_v52 = vpop.eup %1238 }
 0xfcc   :  { %707 = vrot.lane.b32.xlu1 %v1239_v52, %s1294_s18 }
 0xfcf   :  { %v1241_v54 = vpop.eup %1240 }
 0xfd0   :  { %v699_v55 = vadd.f32 1.0, %v1241_v54 }
 0xfd2   :  { %1242 = vrcp.f32 %v699_v55 }
 0xfdc   :  { %v1243_v56 = vpop.eup %1242 }
 0xfdd   :  { %v705_v61 = vmul.f32 %v1243_v56, %v703_v60 }
0x103e   :  { %v708_v57 = vpop.permute.xlu1 %707 }
0x103f   :  { %v710_v47 = vmul.f32 %v1243_v56, %v708_v57 }
0x1041   :  { %712 = vrot.lane.b32.xlu0 %v710_v47, %s1295_s19 }
0x1045   :  { %725 = vperm.xlu0 %1186, %v723_v58  }
0x10b3   :  { %v713_v11 = vpop.permute.xlu0 %712 }
0x10b4   :  { %v715_v62 = vadd.f32 %v713_v11, %v705_v61 }
0x10b6   :  { %1244 = vtanh.f32 %v715_v62  ;;  %v739_v63 = vrot.slane %v715_v62, 2 }
0x10b8   :  { %740 = vrot.lane.b32.xlu0 %v739_v63, %s1296_s20 }
0x10c0   :  { %v1245_v0 = vpop.eup %1244 }
0x10c1   :  { %718 = vrot.lane.b32.xlu1 %v1245_v0, %s1294_s18 }
0x10c4   :  { %v726_v6 = vpop.permute.xlu0 %725 }
0x10c5   :  { %vm727_vm0 = vcmp.eq.s32.totalorder %v726_v6, 1  ;;  %v930_v6 = vld [vmem:[%s1600_s2 + $0xf0] sm:$0xff] }
0x112a   :  { %v741_v13 = vpop.permute.xlu0 %740 }
0x1133   :  { %v719_v1 = vpop.permute.xlu1 %718 }
0x1134   :  { %v721_v2 = vmul.f32 %v1243_v56, %v719_v1 }
0x1136   :  { %v729_v3 = vrot.slane %v721_v2, 2 }
0x1138   :  { %v1193_v4 = vpack.i.bf16 %v643_v40, %v729_v3 }
0x113a   :  { %1194 = vrot.lane.b32.xlu1 %v1193_v4, %s1295_s19  ;;  %v929_v4 = vld [vmem:[%s1600_s2 + $0xe8] sm:$0xff] }
0x113e   :  { %743 = vrot.lane.b32.xlu1 %v644_v59, %s1296_s20 }
0x11ac   :  { %v1195_v7 = vpop.permute.xlu1 %1194 }
0x11ad   :  { %v1197_v8 = vunpack.i.h.bf16 %v1195_v7  ;;  %v1196_v10 = vunpack.i.l.bf16 %v1195_v7  ;;  %v933_v7 = vpack.c.bf16 %v930_v6, %v929_v4 }
0x11af   :  { %v737_v12 = vsel %vm727_vm0, %v1196_v10, %v1197_v8  ;;  %v932_v8 = vld [vmem:[%s1600_s2 + $0x100] sm:$0xff] }
0x11b0   :  { %v747_v14 = vpack.c.bf16 %v737_v12, %v737_v12  ;;  %v744_v15 = vpop.permute.xlu1 %743 }
0x11b1   :  { %v746_v17 = vsel %vm727_vm0, %v741_v13, %v744_v15 }
0x11b2   :  { %v802_v18 = vrot.slane %v746_v17, 4  ;;  %1159 = vmatmul.mubr.msk.bf16.vlgmr.msra.gmra.mrb[20].mxu1 %vm196_vm5, %v747_v14 }
0x11b3   :  { %1174 = vmatprep.mubr.msk.bf16.mxu1 %vm1292_vm1, %v1291_v41  ;;  %vm823_vm1 = vcmp.gt.s32.totalorder %v1356_v16, 6  ;;  %1171 = vmatpush3.bf16.msra.mxu1 %v933_v7 }
0x11b4   :  { %803 = vrot.lane.b32.xlu1 %v802_v18, %s1295_s19  ;;  %v824_v33 = vsel %vm823_vm1, 1, %v1290_v5  ;;  %1172 = vmatprep.subr.bf16.mxu1 %v1291_v41 }
0x1226   :  { %v804_v34 = vpop.permute.xlu1 %803 }
0x1285   :  { %v785_v19 = vpop.f32.mrb[20].mxu1 }
0x1286   :  { %v792_v20 = vrot.slane %v785_v19, 4  ;;  %v1160_v21 = vpop.f32.mrb[21].mxu1  ;;  %v1024_v19 = vld [vmem:[%s1600_s2 + $0x108] ss:$0 sm:$0xff] }
0x1287   :  { %v788_v22 = vpop.f32.mrb[22].mxu1 }
0x1288   :  { %v794_v23 = vadd.f32 %v792_v20, %v1453_v9  ;;  %v1161_v24 = vpop.f32.mrb[23].mxu1 }
0x128a   :  { %1246 = vtanh.f32 %v794_v23  ;;  %v795_v26 = vsub.f32 0.0, %v794_v23 }
0x128c   :  { %v796_v27 = vmul.f32 1.442695, %v795_v26 }
0x128e   :  { %1248 = vpow2.f32 %v796_v27 }
0x1294   :  { %v1247_v25 = vpop.eup %1246 }
0x1295   :  { %808 = vrot.lane.b32.xlu0 %v1247_v25, %s1294_s18 }
0x1298   :  { %v1249_v28 = vpop.eup %1248 }
0x1299   :  { %v798_v29 = vadd.f32 1.0, %v1249_v28 }
0x129b   :  { %1250 = vrcp.f32 %v798_v29 }
0x12a5   :  { %v1251_v30 = vpop.eup %1250 }
0x12a6   :  { %v806_v35 = vmul.f32 %v1251_v30, %v804_v34 }
0x1307   :  { %v809_v31 = vpop.permute.xlu0 %808 }
0x1308   :  { %v811_v32 = vmul.f32 %v1251_v30, %v809_v31 }
0x130a   :  { %813 = vrot.lane.b32.xlu0 %v811_v32, %s1295_s19 }
0x130e   :  { %826 = vperm.xlu0 %1186, %v824_v33  }
0x137c   :  { %v814_v36 = vpop.permute.xlu0 %813 }
0x137d   :  { %v816_v37 = vadd.f32 %v814_v36, %v806_v35 }
0x137f   :  { %1252 = vtanh.f32 %v816_v37  ;;  %v836_v38 = vrot.slane %v816_v37, 4 }
0x1381   :  { %837 = vrot.lane.b32.xlu0 %v836_v38, %s1296_s20 }
0x1389   :  { %v1253_v39 = vpop.eup %1252 }
0x138a   :  { %819 = vrot.lane.b32.xlu1 %v1253_v39, %s1294_s18 }
0x138d   :  { %v827_v40 = vpop.permute.xlu0 %826 }
0x138e   :  { %vm828_vm2 = vcmp.eq.s32.totalorder %v827_v40, 1 }
0x13f3   :  { %v838_v42 = vpop.permute.xlu0 %837 }
0x13f4   :  { %v840_v43 = vsel %vm828_vm2, %v838_v42, %v746_v17 }
0x13f5   :  { %v896_v45 = vrot.slane %v840_v43, 2 }
0x13f7   :  { %897 = vrot.lane.b32.xlu0 %v896_v45, %s1295_s19 }
0x13fc   :  { %v820_v46 = vpop.permute.xlu1 %819 }
0x13fd   :  { %v822_v48 = vmul.f32 %v1251_v30, %v820_v46 }
0x13ff   :  { %v830_v49 = vrot.slane %v822_v48, 4 }
0x1401   :  { %831 = vrot.lane.b32.xlu1 %v830_v49, %s1295_s19 }
0x1469   :  { %v898_v0 = vpop.permute.xlu0 %897 }
0x1473   :  { %v832_v50 = vpop.permute.xlu1 %831 }
0x1474   :  { %v834_v51 = vsel %vm828_vm2, %v832_v50, %v737_v12 }
0x1475   :  { %v841_v52 = vpack.c.bf16 %v834_v51, %v834_v51 }
0x1477   :  { %1167 = vmatmul.mubr.msk.bf16.vlgmr.msra.gmra.mrb[16].mxu0 %vm196_vm5, %v841_v52 }
0x154a   :  { %v879_v53 = vpop.f32.mrb[16].mxu0 }
0x154b   :  { %v886_v44 = vrot.slane %v879_v53, 2  ;;  %v1168_v54 = vpop.f32.mrb[17].mxu0 }
0x154c   :  { %v882_v55 = vpop.f32.mrb[18].mxu0 }
0x154d   :  { %v888_v56 = vadd.f32 %v886_v44, %v1453_v9  ;;  %v1169_v57 = vpop.f32.mrb[19].mxu0  ;;  %v918_v9 = vsel %vm917_vm3, 1, %v1290_v5  ;;  %v931_v5 = vld [vmem:[%s1600_s2 + $0xf8] sm:$0xff]  ;;  %s1297_s2 = smov [#allocation2]  }
0x154e   :  { %v934_v10 = vpack.c.bf16 %v932_v8, %v931_v5  ;;  %s1004_s4 = sshll.u32 %s1297_s2, 4  ;;  %s1005_s4 = int_to_ptr.vmem [resolvable:$true] %s1004_s4 }
0x154f   :  { %1254 = vtanh.f32 %v888_v56  ;;  %v889_v58 = vsub.f32 0.0, %v888_v56  ;;  %s1266_s5 = scalar_lea.vmem %s1005_s4, 32  ;;  %p1271_p1 = scmp.lt.s32.totalorder %s1005_s4, %s1005_s4 }
0x1550   :  { %1173 = vmatpush3.bf16.msra.mxu1 %v934_v10  ;;  %p1267_p0 = scmp.ne.s32.totalorder %s1005_s4, %s1266_s5  ;;  %p1272_p2 = scmp.lt.s32.totalorder %s1266_s5, %s1266_s5 }
0x1551   :  { %v890_v59 = vmul.f32 1.442695, %v889_v58 }
0x1552   :  { %p1273_p3 = por %p1272_p2, %p1271_p1 }
0x1553   :  { %1256 = vpow2.f32 %v890_v59 }
0x1554   :  { %p1274_p4 = pnand %p1273_p3, %p1267_p0 }
0x1559   :  { %v1255_v47 = vpop.eup %1254 }
0x155a   :  { %902 = vrot.lane.b32.xlu1 %v1255_v47, %s1294_s18 }
0x155d   :  { %v1257_v60 = vpop.eup %1256 }
0x155e   :  { %v892_v61 = vadd.f32 1.0, %v1257_v60 }
0x1560   :  { %1258 = vrcp.f32 %v892_v61 }
0x156a   :  { %v1259_v11 = vpop.eup %1258 }
0x156b   :  { %v900_v1 = vmul.f32 %v1259_v11, %v898_v0 }
0x15cc   :  { %v903_v62 = vpop.permute.xlu1 %902 }
0x15cd   :  { %v905_v63 = vmul.f32 %v1259_v11, %v903_v62 }
0x15cf   :  { %907 = vrot.lane.b32.xlu1 %v905_v63, %s1295_s19 }
0x15d3   :  { %920 = vperm.xlu1 %1192, %v918_v9  }
0x1641   :  { %v908_v2 = vpop.permute.xlu1 %907 }
0x1642   :  { %v910_v3 = vadd.f32 %v908_v2, %v900_v1 }
0x1644   :  { %1260 = vtanh.f32 %v910_v3 }
0x164e   :  { %v1261_v16 = vpop.eup %1260 }
0x164f   :  { %913 = vrot.lane.b32.xlu0 %v1261_v16, %s1294_s18 }
0x1652   :  { %v921_v15 = vpop.permute.xlu1 %920 }
0x1653   :  { %vm922_vm4 = vcmp.eq.s32.totalorder %v921_v15, 1 }
0x16c1   :  { %v914_v12 = vpop.permute.xlu0 %913 }
0x16c2   :  { %v916_v13 = vmul.f32 %v1259_v11, %v914_v12 }
0x16c4   :  { %v924_v14 = vrot.slane %v916_v13, 6 }
0x16c6   :  { %925 = vrot.lane.b32.xlu0 %v924_v14, %s1295_s19 }
0x1738   :  { %v926_v41 = vpop.permute.xlu0 %925 }
0x1739   :  { %v928_v17 = vsel %vm922_vm4, %v926_v41, %v834_v51 }
0x173a   :  { %v936_v18 = vpack.c.bf16 %v928_v17, %v928_v17 }
0x173c   :  { %1175 = vmatmul.mubr.msk.bf16.vlgmr.msra.gmra.mrb[24].mxu1 %vm196_vm5, %v936_v18 }
0x180f   :  { %v978_v20 = vpop.f32.mrb[24].mxu1 }
0x1810   :  { %v979_v21 = vadd.f32 %v1024_v19, %v978_v20  ;;  %v1176_v22 = vpop.f32.mrb[25].mxu1 }
0x1811   :  { %v981_v23 = vpop.f32.mrb[26].mxu1 }
0x1812   :  { %v1177_v24 = vpop.f32.mrb[27].mxu1  ;;  %v985_v25 = vsel %vm984_vm6, %v979_v21, -inf }
0x1813   :  { %986 = vmax.xlane.f32.xlu1 %v985_v25 }
0x18a0   :  { %v987_v26 = vpop.xlane.xlu1 %986 }
0x18a1   :  { %v988_v27 = vsub.f32 %v979_v21, %v987_v26 }
0x18a3   :  { %v989_v28 = vmul.f32 1.442695, %v988_v27 }
0x18a5   :  { %1262 = vpow2.f32 %v989_v28 }
0x18af   :  { %v1263_v29 = vpop.eup %1262 }
0x18b0   :  { %v991_v30 = vsel %vm984_vm6, %v1263_v29, 0.0 }
0x18b1   :  { %992 = vadd.xlane.f32.xlu0 %v991_v30 }
0x193e   :  { %v993_v31 = vpop.xlane.xlu0 %992 }
0x193f   :  { %1264 = vlog2.f32 %v993_v31 }
0x1949   :  { %v1265_v32 = vpop.eup %1264 }
0x194a   :  { %v995_v33 = vmul.f32 0.6931472, %v1265_v32 }
0x194c   :  { %v996_v34 = vsub.f32 %v988_v27, %v995_v33 }
0x194e   :  { %997 = vst.msk [vmem:[#allocation2] sm:$0x3] %vm984_vm6, %v996_v34 }
0x194f   :  { %1277 = shalt.err (!%p1274_p4)
}
0x1950   :  { %s1278_s8 = scalar_lea.hbm %s1601_s3, 32 }
0x1951   :  { %p1279_p5 = scmp.ne.s32.totalorder %s1601_s3, %s1278_s8  ;;  %p1282_p6 = scmp.lt.u32.totalorder %s1278_s8, %s1601_s3 }
0x1953   :  { %p1284_p7 = pnand %p1282_p6, %p1279_p5 }
0x1955   :  { %1287 = shalt.err (!%p1284_p7)
}
0x1956   :  { %1007 = dma.vmem_to_hbm [thread:$0]  %s1005_s4, 32, %s1601_s3, [#allocation3]  }
0x1957   :  { %1288 = dma.done.wait [#allocation3], 32  }
0x1958   :  { %1289 = vsyncadd [#allocation3], 4294967264 }
0x1959   :  { %1011 = vsyncpa [#allocation3], 1 }

</bundles_post_ra>
